<compile_context>
chip_gen: v7x
topology: tpu7x:2x2x1
jax: 0.10.0
libtpu: 0.0.40
codegen_flags: <defaults>
</compile_context>

<pallas_src>
import functools

import jax
import jax.numpy as jnp
from jax.experimental import pallas as pl
from jax.experimental.pallas import tpu as pltpu


# ------------------------------ Pallas kernel ------------------------------ #

def _fused_de_basic_block_kernel(x_ref, w1_ref, b1_ref, w2_ref, b2_ref, mask_ref,
                                 out_ref, col1_ref, y1f_ref, col2_ref,
                                 *, H, W, Cin, P):
    """One image per grid step.

    Flat layout: every spatial plane is stored row-major with padded width
    Wp = W + 2, so a 3x3 conv tap at offset (kh, kw) is the *contiguous*
    lane-slice [kh*Wp + kw : kh*Wp + kw + H*Wp] of the flat buffer.  Columns
    q = m*Wp + n with n >= W are "wrap garbage" and are masked to zero.

    x_ref   : (1, Cin, Lx) bf16, width+height zero-padded, row-flattened
    w1_ref  : (P, 9*Cin)  bf16      b1_ref : (P, 1)  f32
    w2_ref  : (4P, 9*P)   bf16      b2_ref : (4P, 1) f32
    mask_ref: (1, H*Wp)   f32  (1 for valid columns, 0 for wrap columns)
    out_ref : (1, 4P, H*Wp) f32, rows ordered (parity_h, parity_w, channel)
    col1_ref: (9*Cin, H*Wp) bf16 scratch (stage-1 im2col)
    y1f_ref : (P, Lx)       bf16 scratch (stage-1 result, re-padded & flattened)
    col2_ref: (9*P, H*Wp)   bf16 scratch (stage-2 im2col)
    """
    f32 = jnp.float32
    Wp = W + 2
    HWp = H * Wp
    Ly = y1f_ref.shape[1]

    # ----- stage 1: Conv2d 3x3 pad=1 (+ folded BN1 + bias) + ReLU ------------
    # im2col = 9 contiguous lane-slices of the flat padded input.
    for t in range(9):
        kh, kw = divmod(t, 3)
        off = kh * Wp + kw
        col1_ref[t * Cin:(t + 1) * Cin, :] = x_ref[0, :, off:off + HWp]

    acc1 = jnp.dot(w1_ref[...], col1_ref[...], preferred_element_type=f32)
    y1 = jnp.maximum(acc1 + b1_ref[...], 0.0) * mask_ref[...]      # (P, H*Wp)

    # ----- re-pad y1 into a flat zero-haloed buffer for stage 2 --------------
    # Interior goes to a single contiguous slice; the masked wrap columns land
    # exactly on the halo columns (and are zero).  Only the 1-row top/bottom
    # halo border needs explicit zeroing (cheap, done every step so the kernel
    # is correct even when the parallel batch axis is split across cores).
    lo = Wp + 1
    y1f_ref[:, 0:lo] = jnp.zeros((P, lo), y1f_ref.dtype)
    y1f_ref[:, lo + HWp:] = jnp.zeros((P, Ly - (lo + HWp)), y1f_ref.dtype)
    y1f_ref[:, lo:lo + HWp] = y1.astype(y1f_ref.dtype)

    # ----- stage 2: ConvTranspose2d 4x4 s2 p1 (polyphase) + BN2 + ReLU -------
    for t in range(9):
        a, b = divmod(t, 3)
        off = a * Wp + b
        col2_ref[t * P:(t + 1) * P, :] = y1f_ref[:, off:off + HWp]

    acc2 = jnp.dot(w2_ref[...], col2_ref[...], preferred_element_type=f32)
    out_ref[0] = jnp.maximum(acc2 + b2_ref[...], 0.0).astype(out_ref.dtype)


# --------------------- one-time parameter preparation ---------------------- #

def prepare_params(params, eps=1e-5):
    """Fold eval-mode BN + conv biases into the weights and pre-pack them into
    the (Cout, 9*Cin) im2col layouts used by the fused kernel (called once)."""
    conv1_w = params['conv1_w']            # (P, Cin, 3, 3)   (out, in, kh, kw)
    deconv_w = params['deconv_w']          # (P, P, 4, 4)     (cin, cout, kh, kw)
    P, Cin = conv1_w.shape[0], conv1_w.shape[1]

    s1 = params['bn1_gamma'] * jax.lax.rsqrt(params['bn1_var'] + eps)
    b1 = params['bn1_beta'] - params['bn1_mean'] * s1 + s1 * params['conv1_b']
    s2 = params['bn2_gamma'] * jax.lax.rsqrt(params['bn2_var'] + eps)
    b2 = params['bn2_beta'] - params['bn2_mean'] * s2 + s2 * params['deconv_b']

    # Stage 1: (P, 9*Cin), column = (kh*3+kw)*Cin + cin, BN1 folded into rows.
    w1 = jnp.transpose(conv1_w, (0, 2, 3, 1)).reshape(P, 9 * Cin)
    w1 = w1 * s1[:, None]

    # Stage 2 (polyphase ConvTranspose k=4 s=2 p=1):
    #   out[2m+ph, 2n+pw, p] = sum_{dh,dw,c} y1pad[m+ph+dh, n+pw+dw, c]
    #                          * Wt[c, p, ktab[ph][dh], ktab[pw][dw]]
    # packed as (4P, 9*P): row = (ph*2+pw)*P + p, column = (a*3+b)*P + cin,
    # with BN2 folded into the rows.
    ktab = ((3, 1), (2, 0))
    w2p = jnp.zeros((9, P, 4 * P), jnp.float32)
    for ph in range(2):
        for pw in range(2):
            col = (ph * 2 + pw) * P
            for dh in range(2):
                for dw in range(2):
                    off = (ph + dh) * 3 + (pw + dw)
                    tap = deconv_w[:, :, ktab[ph][dh], ktab[pw][dw]] * s2[None, :]
                    w2p = w2p.at[off, :, col:col + P].set(tap)
    w2 = jnp.transpose(w2p, (2, 0, 1)).reshape(4 * P, 9 * P)

    return {
        'w1': w1.astype(jnp.bfloat16),                       # (P, 9*Cin)
        'b1': b1[:, None].astype(jnp.float32),               # (P, 1)
        'w2': w2.astype(jnp.bfloat16),                       # (4P, 9*P)
        'b2': jnp.tile(b2, 4)[:, None].astype(jnp.float32),  # (4P, 1)
    }


# --------------------------------- forward --------------------------------- #

@jax.jit
def de_basic_block_forward(x_nchw, prep):
    """NCHW in, NCHW out — matches DeBasicBlock.forward (eval-mode BN)."""
    N, Cin, H, W = x_nchw.shape
    P = prep['b1'].shape[0]
    Wp = W + 2
    HWp = H * Wp
    Lx = (H + 3) * Wp          # (1 top halo + H + 1 bottom halo + 1 slack) rows

    # 1-pixel halo pad of the (small) input + row-flatten: inside the kernel
    # every conv tap becomes a contiguous lane-slice (no reshape relayouts).
    x_flat = jnp.pad(x_nchw, ((0, 0), (0, 0), (1, 2), (1, 1)))
    x_flat = x_flat.reshape(N, Cin, Lx).astype(jnp.bfloat16)

    # Valid-column mask for the width-padded flat layout (0 on wrap columns).
    mask = (jnp.arange(HWp, dtype=jnp.int32) % Wp < W)
    mask = mask.astype(jnp.float32)[None, :]

    kern = functools.partial(_fused_de_basic_block_kernel,
                             H=H, W=W, Cin=Cin, P=P)
    out = pl.pallas_call(
        kern,
        out_shape=jax.ShapeDtypeStruct((N, 4 * P, HWp), jnp.float32),
        grid=(N,),
        in_specs=[
            pl.BlockSpec((1, Cin, Lx), lambda n: (n, 0, 0)),
            pl.BlockSpec((P, 9 * Cin), lambda n: (0, 0)),
            pl.BlockSpec((P, 1), lambda n: (0, 0)),
            pl.BlockSpec((4 * P, 9 * P), lambda n: (0, 0)),
            pl.BlockSpec((4 * P, 1), lambda n: (0, 0)),
            pl.BlockSpec((1, HWp), lambda n: (0, 0)),
        ],
        out_specs=pl.BlockSpec((1, 4 * P, HWp), lambda n: (n, 0, 0)),
        scratch_shapes=[
            pltpu.VMEM((9 * Cin, HWp), jnp.bfloat16),   # stage-1 im2col
            pltpu.VMEM((P, Lx), jnp.bfloat16),          # flat re-padded y1
            pltpu.VMEM((9 * P, HWp), jnp.bfloat16),     # stage-2 im2col
        ],
        compiler_params=pltpu.CompilerParams(
            dimension_semantics=("parallel",),
            vmem_limit_bytes=32 * 1024 * 1024),
    )(x_flat, prep['w1'], prep['b1'], prep['w2'], prep['b2'], mask)

    # (N, 4P, H*Wp) -> (N, P, 2H, 2W): drop wrap columns, unpack parities.
    y = out.reshape(N, 2, 2, P, H, Wp)[:, :, :, :, :, :W]   # (n, ph, pw, p, h, w)
    y = jnp.transpose(y, (0, 3, 4, 1, 5, 2))                # (n, p, h, ph, w, pw)
    return y.reshape(N, P, 2 * H, 2 * W)


# -------------------------------- reference --------------------------------- #

def de_basic_block_reference(x_nchw, params):
    """Pure-XLA f32 reference (same eval-mode BN semantics) for verification."""
    def bn_relu(y, gamma, beta, mean, var):
        s = gamma / jnp.sqrt(var + 1e-5)
        b = beta - mean * s
        return jnp.maximum(y * s[None, :, None, None] + b[None, :, None, None], 0.0)

    y = jax.lax.conv_general_dilated(
        x_nchw, params['conv1_w'], (1, 1), ((1, 1), (1, 1)),
        dimension_numbers=('NCHW', 'OIHW', 'NCHW'))
    y = y + params['conv1_b'][None, :, None, None]
    y = bn_relu(y, params['bn1_gamma'], params['bn1_beta'],
                params['bn1_mean'], params['bn1_var'])

    w_flip_oihw = jnp.transpose(params['deconv_w'][:, :, ::-1, ::-1], (1, 0, 2, 3))
    y = jax.lax.conv_general_dilated(
        y, w_flip_oihw, (1, 1), ((2, 2), (2, 2)), lhs_dilation=(2, 2),
        dimension_numbers=('NCHW', 'OIHW', 'NCHW'))
    y = y + params['deconv_b'][None, :, None, None]
    y = bn_relu(y, params['bn2_gamma'], params['bn2_beta'],
                params['bn2_mean'], params['bn2_var'])
    return y


# ----------------------------------- main ----------------------------------- #

if __name__ == "__main__":
    inplanes, planes = 4, 8
    N, H, W = 2, 16, 16

    key = jax.random.PRNGKey(0)
    ks = jax.random.split(key, 12)

    params = {
        'conv1_w':  jax.random.normal(ks[0], (planes, inplanes, 3, 3), jnp.float32) * 0.2,
        'conv1_b':  jax.random.normal(ks[1], (planes,), jnp.float32) * 0.1,
        'bn1_gamma': 1.0 + 0.1 * jax.random.normal(ks[2], (planes,), jnp.float32),
        'bn1_beta':  0.1 * jax.random.normal(ks[3], (planes,), jnp.float32),
        'bn1_mean':  0.05 * jax.random.normal(ks[4], (planes,), jnp.float32),
        'bn1_var':   jax.random.uniform(ks[5], (planes,), jnp.float32, 0.5, 1.5),
        # ConvTranspose2d weight layout: (in_channels, out_channels, kh, kw)
        'deconv_w': jax.random.normal(ks[6], (planes, planes, 4, 4), jnp.float32) * 0.2,
        'deconv_b': jax.random.normal(ks[7], (planes,), jnp.float32) * 0.1,
        'bn2_gamma': 1.0 + 0.1 * jax.random.normal(ks[8], (planes,), jnp.float32),
        'bn2_beta':  0.1 * jax.random.normal(ks[9], (planes,), jnp.float32),
        'bn2_mean':  0.05 * jax.random.normal(ks[10], (planes,), jnp.float32),
        'bn2_var':   jax.random.uniform(ks[11], (planes,), jnp.float32, 0.5, 1.5),
    }

    x = jax.random.normal(jax.random.PRNGKey(42), (N, inplanes, H, W), jnp.float32)

    prep = prepare_params(params)                     # one-time weight prep
    out = jax.block_until_ready(de_basic_block_forward(x, prep))
    ref = jax.block_until_ready(de_basic_block_reference(x, params))

    assert out.shape == (N, planes, 2 * H, 2 * W), out.shape
    # Tolerance relaxed vs. the f32 reference because the MXU operands are bf16
    # (f32 accumulation / bias / BN / ReLU).
    assert jnp.allclose(out, ref, atol=2e-1, rtol=2e-2), \
        float(jnp.max(jnp.abs(out - ref)))

    print("KERNEL_OK")
</pallas_src>

<mosaic_0001>
module attributes {stable_mosaic.version = 11 : i64} {
  func.func @_fused_de_basic_block_kernel(%arg0: i32, %arg1: memref<1x4x342xbf16, #tpu.memory_space<vmem>>, %arg2: memref<8x36xbf16, #tpu.memory_space<vmem>>, %arg3: memref<8x1xf32, #tpu.memory_space<vmem>>, %arg4: memref<32x72xbf16, #tpu.memory_space<vmem>>, %arg5: memref<32x1xf32, #tpu.memory_space<vmem>>, %arg6: memref<1x288xf32, #tpu.memory_space<vmem>>, %arg7: memref<1x32x288xf32, #tpu.memory_space<vmem>>, %arg8: memref<36x288xbf16, #tpu.memory_space<vmem>>, %arg9: memref<8x342xbf16, #tpu.memory_space<vmem>>, %arg10: memref<72x288xbf16, #tpu.memory_space<vmem>>) attributes {dimension_semantics = [#tpu.dimension_semantics<parallel>], iteration_bounds = array<i64: 2>, scalar_prefetch = 0 : i64, scratch_operands = 3 : i64, tpu.core_type = #tpu.core_type<tc>, window_params = [{transform_indices = @transform_0, window_bounds = array<i64: 1, 4, 342>}, {pipeline_mode = #tpu.pipeline_mode<synchronous>, transform_indices = @transform_1, window_bounds = array<i64: 8, 36>}, {pipeline_mode = #tpu.pipeline_mode<synchronous>, transform_indices = @transform_2, window_bounds = array<i64: 8, 1>}, {pipeline_mode = #tpu.pipeline_mode<synchronous>, transform_indices = @transform_3, window_bounds = array<i64: 32, 72>}, {pipeline_mode = #tpu.pipeline_mode<synchronous>, transform_indices = @transform_4, window_bounds = array<i64: 32, 1>}, {pipeline_mode = #tpu.pipeline_mode<synchronous>, transform_indices = @transform_5, window_bounds = array<i64: 1, 288>}, {transform_indices = @transform_6, window_bounds = array<i64: 1, 32, 288>}]} {
    %c0 = arith.constant 0 : index
    %c0_0 = arith.constant 0 : index
    %c0_1 = arith.constant 0 : index
    %0 = vector.load %arg1[%c0, %c0_0, %c0_1] : memref<1x4x342xbf16, #tpu.memory_space<vmem>>, vector<1x4x288xbf16>
    %1 = vector.shape_cast %0 : vector<1x4x288xbf16> to vector<4x288xbf16>
    %c0_2 = arith.constant 0 : index
    %c0_3 = arith.constant 0 : index
    %2 = vector.load %arg8[%c0_2, %c0_3] : memref<36x288xbf16, #tpu.memory_space<vmem>>, vector<4x288xbf16>
    tpu.vector_store %arg8[%c0_2, %c0_3], %1 {strides = array<i32>} : memref<36x288xbf16, #tpu.memory_space<vmem>>, vector<4x288xbf16>,
    %c0_4 = arith.constant 0 : index
    %c0_5 = arith.constant 0 : index
    %c1 = arith.constant 1 : index
    %3 = vector.load %arg1[%c0_4, %c0_5, %c1] : memref<1x4x342xbf16, #tpu.memory_space<vmem>>, vector<1x4x288xbf16>
    %4 = vector.shape_cast %3 : vector<1x4x288xbf16> to vector<4x288xbf16>
    %c4 = arith.constant 4 : index
    %c0_6 = arith.constant 0 : index
    %5 = vector.load %arg8[%c4, %c0_6] : memref<36x288xbf16, #tpu.memory_space<vmem>>, vector<4x288xbf16>
    tpu.vector_store %arg8[%c4, %c0_6], %4 {strides = array<i32>} : memref<36x288xbf16, #tpu.memory_space<vmem>>, vector<4x288xbf16>,
    %c0_7 = arith.constant 0 : index
    %c0_8 = arith.constant 0 : index
    %c2 = arith.constant 2 : index
    %6 = vector.load %arg1[%c0_7, %c0_8, %c2] : memref<1x4x342xbf16, #tpu.memory_space<vmem>>, vector<1x4x288xbf16>
    %7 = vector.shape_cast %6 : vector<1x4x288xbf16> to vector<4x288xbf16>
    %c8 = arith.constant 8 : index
    %c0_9 = arith.constant 0 : index
    %8 = vector.load %arg8[%c8, %c0_9] : memref<36x288xbf16, #tpu.memory_space<vmem>>, vector<4x288xbf16>
    tpu.vector_store %arg8[%c8, %c0_9], %7 {strides = array<i32>} : memref<36x288xbf16, #tpu.memory_space<vmem>>, vector<4x288xbf16>,
    %c0_10 = arith.constant 0 : index
    %c0_11 = arith.constant 0 : index
    %c18 = arith.constant 18 : index
    %9 = vector.load %arg1[%c0_10, %c0_11, %c18] : memref<1x4x342xbf16, #tpu.memory_space<vmem>>, vector<1x4x288xbf16>
    %10 = vector.shape_cast %9 : vector<1x4x288xbf16> to vector<4x288xbf16>
    %c12 = arith.constant 12 : index
    %c0_12 = arith.constant 0 : index
    %11 = vector.load %arg8[%c12, %c0_12] : memref<36x288xbf16, #tpu.memory_space<vmem>>, vector<4x288xbf16>
    tpu.vector_store %arg8[%c12, %c0_12], %10 {strides = array<i32>} : memref<36x288xbf16, #tpu.memory_space<vmem>>, vector<4x288xbf16>,
    %c0_13 = arith.constant 0 : index
    %c0_14 = arith.constant 0 : index
    %c19 = arith.constant 19 : index
    %12 = vector.load %arg1[%c0_13, %c0_14, %c19] : memref<1x4x342xbf16, #tpu.memory_space<vmem>>, vector<1x4x288xbf16>
    %13 = vector.shape_cast %12 : vector<1x4x288xbf16> to vector<4x288xbf16>
    %c16 = arith.constant 16 : index
    %c0_15 = arith.constant 0 : index
    %14 = vector.load %arg8[%c16, %c0_15] : memref<36x288xbf16, #tpu.memory_space<vmem>>, vector<4x288xbf16>
    tpu.vector_store %arg8[%c16, %c0_15], %13 {strides = array<i32>} : memref<36x288xbf16, #tpu.memory_space<vmem>>, vector<4x288xbf16>,
    %c0_16 = arith.constant 0 : index
    %c0_17 = arith.constant 0 : index
    %c20 = arith.constant 20 : index
    %15 = vector.load %arg1[%c0_16, %c0_17, %c20] : memref<1x4x342xbf16, #tpu.memory_space<vmem>>, vector<1x4x288xbf16>
    %16 = vector.shape_cast %15 : vector<1x4x288xbf16> to vector<4x288xbf16>
    %c20_18 = arith.constant 20 : index
    %c0_19 = arith.constant 0 : index
    %17 = vector.load %arg8[%c20_18, %c0_19] : memref<36x288xbf16, #tpu.memory_space<vmem>>, vector<4x288xbf16>
    tpu.vector_store %arg8[%c20_18, %c0_19], %16 {strides = array<i32>} : memref<36x288xbf16, #tpu.memory_space<vmem>>, vector<4x288xbf16>,
    %c0_20 = arith.constant 0 : index
    %c0_21 = arith.constant 0 : index
    %c36 = arith.constant 36 : index
    %18 = vector.load %arg1[%c0_20, %c0_21, %c36] : memref<1x4x342xbf16, #tpu.memory_space<vmem>>, vector<1x4x288xbf16>
    %19 = vector.shape_cast %18 : vector<1x4x288xbf16> to vector<4x288xbf16>
    %c24 = arith.constant 24 : index
    %c0_22 = arith.constant 0 : index
    %20 = vector.load %arg8[%c24, %c0_22] : memref<36x288xbf16, #tpu.memory_space<vmem>>, vector<4x288xbf16>
    tpu.vector_store %arg8[%c24, %c0_22], %19 {strides = array<i32>} : memref<36x288xbf16, #tpu.memory_space<vmem>>, vector<4x288xbf16>,
    %c0_23 = arith.constant 0 : index
    %c0_24 = arith.constant 0 : index
    %c37 = arith.constant 37 : index
    %21 = vector.load %arg1[%c0_23, %c0_24, %c37] : memref<1x4x342xbf16, #tpu.memory_space<vmem>>, vector<1x4x288xbf16>
    %22 = vector.shape_cast %21 : vector<1x4x288xbf16> to vector<4x288xbf16>
    %c28 = arith.constant 28 : index
    %c0_25 = arith.constant 0 : index
    %23 = vector.load %arg8[%c28, %c0_25] : memref<36x288xbf16, #tpu.memory_space<vmem>>, vector<4x288xbf16>
    tpu.vector_store %arg8[%c28, %c0_25], %22 {strides = array<i32>} : memref<36x288xbf16, #tpu.memory_space<vmem>>, vector<4x288xbf16>,
    %c0_26 = arith.constant 0 : index
    %c0_27 = arith.constant 0 : index
    %c38 = arith.constant 38 : index
    %24 = vector.load %arg1[%c0_26, %c0_27, %c38] : memref<1x4x342xbf16, #tpu.memory_space<vmem>>, vector<1x4x288xbf16>
    %25 = vector.shape_cast %24 : vector<1x4x288xbf16> to vector<4x288xbf16>
    %c32 = arith.constant 32 : index
    %c0_28 = arith.constant 0 : index
    %26 = vector.load %arg8[%c32, %c0_28] : memref<36x288xbf16, #tpu.memory_space<vmem>>, vector<4x288xbf16>
    tpu.vector_store %arg8[%c32, %c0_28], %25 {strides = array<i32>} : memref<36x288xbf16, #tpu.memory_space<vmem>>, vector<4x288xbf16>,
    %c0_29 = arith.constant 0 : index
    %c0_30 = arith.constant 0 : index
    %27 = vector.load %arg2[%c0_29, %c0_30] : memref<8x36xbf16, #tpu.memory_space<vmem>>, vector<8x36xbf16>
    %c0_31 = arith.constant 0 : index
    %c0_32 = arith.constant 0 : index
    %28 = vector.load %arg8[%c0_31, %c0_32] : memref<36x288xbf16, #tpu.memory_space<vmem>>, vector<36x288xbf16>
    %cst = arith.constant dense<0.000000e+00> : vector<8x288xf32>
    %29 = tpu.matmul %27, %28, %cst {dimension_numbers = #tpu.dot_dimension_numbers<[1], [0], [0], [1], [0, 0, 1, 1], [], []>} : vector<8x36xbf16>, vector<36x288xbf16>, vector<8x288xf32> -> vector<8x288xf32>
    %c0_33 = arith.constant 0 : index
    %c0_34 = arith.constant 0 : index
    %30 = vector.load %arg3[%c0_33, %c0_34] : memref<8x1xf32, #tpu.memory_space<vmem>>, vector<8x1xf32>
    %31 = vector.broadcast %30 : vector<8x1xf32> to vector<8x288xf32>
    %32 = arith.addf %29, %31 : vector<8x288xf32>
    %cst_35 = arith.constant 0.000000e+00 : f32
    %33 = vector.broadcast %cst_35 : f32 to vector<8x288xf32>
    %34 = arith.maximumf %32, %33 : vector<8x288xf32>
    %c0_36 = arith.constant 0 : index
    %c0_37 = arith.constant 0 : index
    %35 = vector.load %arg6[%c0_36, %c0_37] : memref<1x288xf32, #tpu.memory_space<vmem>>, vector<1x288xf32>
    %36 = vector.broadcast %35 : vector<1x288xf32> to vector<8x288xf32>
    %37 = arith.mulf %34, %36 : vector<8x288xf32>
    %cst_38 = arith.constant 0.000000e+00 : bf16
    %38 = vector.broadcast %cst_38 : bf16 to vector<8x19xbf16>
    %c0_39 = arith.constant 0 : index
    %c0_40 = arith.constant 0 : index
    %39 = vector.load %arg9[%c0_39, %c0_40] : memref<8x342xbf16, #tpu.memory_space<vmem>>, vector<8x19xbf16>
    tpu.vector_store %arg9[%c0_39, %c0_40], %38 {strides = array<i32>} : memref<8x342xbf16, #tpu.memory_space<vmem>>, vector<8x19xbf16>,
    %cst_41 = arith.constant 0.000000e+00 : bf16
    %40 = vector.broadcast %cst_41 : bf16 to vector<8x35xbf16>
    %c0_42 = arith.constant 0 : index
    %c307 = arith.constant 307 : index
    %41 = vector.load %arg9[%c0_42, %c307] : memref<8x342xbf16, #tpu.memory_space<vmem>>, vector<8x35xbf16>
    tpu.vector_store %arg9[%c0_42, %c307], %40 {strides = array<i32>} : memref<8x342xbf16, #tpu.memory_space<vmem>>, vector<8x35xbf16>,
    %42 = arith.truncf %37 : vector<8x288xf32> to vector<8x288xbf16>
    %c0_43 = arith.constant 0 : index
    %c19_44 = arith.constant 19 : index
    %43 = vector.load %arg9[%c0_43, %c19_44] : memref<8x342xbf16, #tpu.memory_space<vmem>>, vector<8x288xbf16>
    tpu.vector_store %arg9[%c0_43, %c19_44], %42 {strides = array<i32>} : memref<8x342xbf16, #tpu.memory_space<vmem>>, vector<8x288xbf16>,
    %c0_45 = arith.constant 0 : index
    %c0_46 = arith.constant 0 : index
    %44 = vector.load %arg9[%c0_45, %c0_46] : memref<8x342xbf16, #tpu.memory_space<vmem>>, vector<8x288xbf16>
    %c0_47 = arith.constant 0 : index
    %c0_48 = arith.constant 0 : index
    %45 = vector.load %arg10[%c0_47, %c0_48] : memref<72x288xbf16, #tpu.memory_space<vmem>>, vector<8x288xbf16>
    tpu.vector_store %arg10[%c0_47, %c0_48], %44 {strides = array<i32>} : memref<72x288xbf16, #tpu.memory_space<vmem>>, vector<8x288xbf16>,
    %c0_49 = arith.constant 0 : index
    %c1_50 = arith.constant 1 : index
    %46 = vector.load %arg9[%c0_49, %c1_50] : memref<8x342xbf16, #tpu.memory_space<vmem>>, vector<8x288xbf16>
    %c8_51 = arith.constant 8 : index
    %c0_52 = arith.constant 0 : index
    %47 = vector.load %arg10[%c8_51, %c0_52] : memref<72x288xbf16, #tpu.memory_space<vmem>>, vector<8x288xbf16>
    tpu.vector_store %arg10[%c8_51, %c0_52], %46 {strides = array<i32>} : memref<72x288xbf16, #tpu.memory_space<vmem>>, vector<8x288xbf16>,
    %c0_53 = arith.constant 0 : index
    %c2_54 = arith.constant 2 : index
    %48 = vector.load %arg9[%c0_53, %c2_54] : memref<8x342xbf16, #tpu.memory_space<vmem>>, vector<8x288xbf16>
    %c16_55 = arith.constant 16 : index
    %c0_56 = arith.constant 0 : index
    %49 = vector.load %arg10[%c16_55, %c0_56] : memref<72x288xbf16, #tpu.memory_space<vmem>>, vector<8x288xbf16>
    tpu.vector_store %arg10[%c16_55, %c0_56], %48 {strides = array<i32>} : memref<72x288xbf16, #tpu.memory_space<vmem>>, vector<8x288xbf16>,
    %c0_57 = arith.constant 0 : index
    %c18_58 = arith.constant 18 : index
    %50 = vector.load %arg9[%c0_57, %c18_58] : memref<8x342xbf16, #tpu.memory_space<vmem>>, vector<8x288xbf16>
    %c24_59 = arith.constant 24 : index
    %c0_60 = arith.constant 0 : index
    %51 = vector.load %arg10[%c24_59, %c0_60] : memref<72x288xbf16, #tpu.memory_space<vmem>>, vector<8x288xbf16>
    tpu.vector_store %arg10[%c24_59, %c0_60], %50 {strides = array<i32>} : memref<72x288xbf16, #tpu.memory_space<vmem>>, vector<8x288xbf16>,
    %c0_61 = arith.constant 0 : index
    %c19_62 = arith.constant 19 : index
    %52 = vector.load %arg9[%c0_61, %c19_62] : memref<8x342xbf16, #tpu.memory_space<vmem>>, vector<8x288xbf16>
    %c32_63 = arith.constant 32 : index
    %c0_64 = arith.constant 0 : index
    %53 = vector.load %arg10[%c32_63, %c0_64] : memref<72x288xbf16, #tpu.memory_space<vmem>>, vector<8x288xbf16>
    tpu.vector_store %arg10[%c32_63, %c0_64], %52 {strides = array<i32>} : memref<72x288xbf16, #tpu.memory_space<vmem>>, vector<8x288xbf16>,
    %c0_65 = arith.constant 0 : index
    %c20_66 = arith.constant 20 : index
    %54 = vector.load %arg9[%c0_65, %c20_66] : memref<8x342xbf16, #tpu.memory_space<vmem>>, vector<8x288xbf16>
    %c40 = arith.constant 40 : index
    %c0_67 = arith.constant 0 : index
    %55 = vector.load %arg10[%c40, %c0_67] : memref<72x288xbf16, #tpu.memory_space<vmem>>, vector<8x288xbf16>
    tpu.vector_store %arg10[%c40, %c0_67], %54 {strides = array<i32>} : memref<72x288xbf16, #tpu.memory_space<vmem>>, vector<8x288xbf16>,
    %c0_68 = arith.constant 0 : index
    %c36_69 = arith.constant 36 : index
    %56 = vector.load %arg9[%c0_68, %c36_69] : memref<8x342xbf16, #tpu.memory_space<vmem>>, vector<8x288xbf16>
    %c48 = arith.constant 48 : index
    %c0_70 = arith.constant 0 : index
    %57 = vector.load %arg10[%c48, %c0_70] : memref<72x288xbf16, #tpu.memory_space<vmem>>, vector<8x288xbf16>
    tpu.vector_store %arg10[%c48, %c0_70], %56 {strides = array<i32>} : memref<72x288xbf16, #tpu.memory_space<vmem>>, vector<8x288xbf16>,
    %c0_71 = arith.constant 0 : index
    %c37_72 = arith.constant 37 : index
    %58 = vector.load %arg9[%c0_71, %c37_72] : memref<8x342xbf16, #tpu.memory_space<vmem>>, vector<8x288xbf16>
    %c56 = arith.constant 56 : index
    %c0_73 = arith.constant 0 : index
    %59 = vector.load %arg10[%c56, %c0_73] : memref<72x288xbf16, #tpu.memory_space<vmem>>, vector<8x288xbf16>
    tpu.vector_store %arg10[%c56, %c0_73], %58 {strides = array<i32>} : memref<72x288xbf16, #tpu.memory_space<vmem>>, vector<8x288xbf16>,
    %c0_74 = arith.constant 0 : index
    %c38_75 = arith.constant 38 : index
    %60 = vector.load %arg9[%c0_74, %c38_75] : memref<8x342xbf16, #tpu.memory_space<vmem>>, vector<8x288xbf16>
    %c64 = arith.constant 64 : index
    %c0_76 = arith.constant 0 : index
    %61 = vector.load %arg10[%c64, %c0_76] : memref<72x288xbf16, #tpu.memory_space<vmem>>, vector<8x288xbf16>
    tpu.vector_store %arg10[%c64, %c0_76], %60 {strides = array<i32>} : memref<72x288xbf16, #tpu.memory_space<vmem>>, vector<8x288xbf16>,
    %c0_77 = arith.constant 0 : index
    %c0_78 = arith.constant 0 : index
    %62 = vector.load %arg4[%c0_77, %c0_78] : memref<32x72xbf16, #tpu.memory_space<vmem>>, vector<32x72xbf16>
    %c0_79 = arith.constant 0 : index
    %c0_80 = arith.constant 0 : index
    %63 = vector.load %arg10[%c0_79, %c0_80] : memref<72x288xbf16, #tpu.memory_space<vmem>>, vector<72x288xbf16>
    %cst_81 = arith.constant dense<0.000000e+00> : vector<32x288xf32>
    %64 = tpu.matmul %62, %63, %cst_81 {dimension_numbers = #tpu.dot_dimension_numbers<[1], [0], [0], [1], [0, 0, 1, 1], [], []>} : vector<32x72xbf16>, vector<72x288xbf16>, vector<32x288xf32> -> vector<32x288xf32>
    %c0_82 = arith.constant 0 : index
    %c0_83 = arith.constant 0 : index
    %65 = vector.load %arg5[%c0_82, %c0_83] : memref<32x1xf32, #tpu.memory_space<vmem>>, vector<32x1xf32>
    %66 = vector.broadcast %65 : vector<32x1xf32> to vector<32x288xf32>
    %67 = arith.addf %64, %66 : vector<32x288xf32>
    %cst_84 = arith.constant 0.000000e+00 : f32
    %68 = vector.broadcast %cst_84 : f32 to vector<32x288xf32>
    %69 = arith.maximumf %67, %68 : vector<32x288xf32>
    %c0_85 = arith.constant 0 : index
    %c0_86 = arith.constant 0 : index
    %c0_87 = arith.constant 0 : index
    %70 = vector.load %arg7[%c0_85, %c0_86, %c0_87] : memref<1x32x288xf32, #tpu.memory_space<vmem>>, vector<1x32x288xf32>
    %71 = vector.shape_cast %70 : vector<1x32x288xf32> to vector<32x288xf32>
    %72 = vector.shape_cast %69 : vector<32x288xf32> to vector<1x32x288xf32>
    tpu.vector_store %arg7[%c0_85, %c0_86, %c0_87], %72 {strides = array<i32>} : memref<1x32x288xf32, #tpu.memory_space<vmem>>, vector<1x32x288xf32>,
    return
  }
  func.func @transform_0(%arg0: i32) -> (i32, i32, i32) {
    %c0_i32 = arith.constant 0 : i32
    %c0_i32_0 = arith.constant 0 : i32
    %c0_i32_1 = arith.constant 0 : i32
    return %arg0, %c0_i32, %c0_i32_0 : i32, i32, i32
  }
  func.func @transform_1(%arg0: i32) -> (i32, i32) {
    %c0_i32 = arith.constant 0 : i32
    %c0_i32_0 = arith.constant 0 : i32
    %c0_i32_1 = arith.constant 0 : i32
    return %c0_i32, %c0_i32_0 : i32, i32
  }
  func.func @transform_2(%arg0: i32) -> (i32, i32) {
    %c0_i32 = arith.constant 0 : i32
    %c0_i32_0 = arith.constant 0 : i32
    %c0_i32_1 = arith.constant 0 : i32
    return %c0_i32, %c0_i32_0 : i32, i32
  }
  func.func @transform_3(%arg0: i32) -> (i32, i32) {
    %c0_i32 = arith.constant 0 : i32
    %c0_i32_0 = arith.constant 0 : i32
    %c0_i32_1 = arith.constant 0 : i32
    return %c0_i32, %c0_i32_0 : i32, i32
  }
  func.func @transform_4(%arg0: i32) -> (i32, i32) {
    %c0_i32 = arith.constant 0 : i32
    %c0_i32_0 = arith.constant 0 : i32
    %c0_i32_1 = arith.constant 0 : i32
    return %c0_i32, %c0_i32_0 : i32, i32
  }
  func.func @transform_5(%arg0: i32) -> (i32, i32) {
    %c0_i32 = arith.constant 0 : i32
    %c0_i32_0 = arith.constant 0 : i32
    %c0_i32_1 = arith.constant 0 : i32
    return %c0_i32, %c0_i32_0 : i32, i32
  }
  func.func @transform_6(%arg0: i32) -> (i32, i32, i32) {
    %c0_i32 = arith.constant 0 : i32
    %c0_i32_0 = arith.constant 0 : i32
    %c0_i32_1 = arith.constant 0 : i32
    return %arg0, %c0_i32, %c0_i32_0 : i32, i32, i32
  }
}

</mosaic_0001>

<bundles_post_ra>
// kernel: de_basic_block_forward.1
= control target key start
LH: loop header
LB: loop body
LE: loop exit
PB: predicated region body
PF: predicated region fallthrough
CT: control target
= control target key end

     0   :  { %s1374_s21 = smov 0   ;;  %s1581_s0 = inlined_call_operand.vmem [shape: bf16[2,4,342], index: 0, kind: input, shape index: {}]   ;;  %s1582_s1 = inlined_call_operand.vmem [shape: bf16[8,36], index: 1, kind: input, shape index: {}]   ;;  %s1583_s2 = inlined_call_operand.vmem [shape: f32[8,1], index: 2, kind: input, shape index: {}]   ;;  %s1584_s3 = inlined_call_operand.vmem [shape: bf16[32,72], index: 3, kind: input, shape index: {}]   ;;  %s1585_s4 = inlined_call_operand.vmem [shape: f32[32,1], index: 4, kind: input, shape index: {}]   ;;  %s1586_s5 = inlined_call_operand.vmem [shape: f32[1,288], index: 5, kind: input, shape index: {}]   ;;  %s1587_s6 = inlined_call_operand.vmem [shape: f32[2,32,288], index: 6, kind: output, shape index: {}]  }
   0x1 LB: > { %s1183_s22 = sadd.s32 4294967295, %s1324_s21   ;;  %p1187_p0 = scmp.ge.s32.totalorder %s1324_s21, 1  ;;  %s1324_s21 = sphi %s1374_s21, %s16_s21  }
   0x2   : > { %p212_p1 = scmp.lt.s32.totalorder %s1324_s21, 3 }
   0x4   : > { %p213_p2 = pnand %p1187_p0, %p212_p1 }
   0x5   : > { %p242_p3 = scmp.lt.s32.totalorder (!%p213_p2), %s1183_s22, 1  ;;  %v266_v0 = vlaneseq (!%p213_p2)  ;;  %v1326_v1 = vmov (!%p213_p2), 1983009808   ;;  %s1327_s27 = smov (!%p213_p2), 126   ;;  %vm273_vm0 = vcmask (!%p213_p2), 254976   ;;  %v1331_v24 = vmov (!%p213_p2), 0.0  }
   0x6   : > { %216 = sbr.rel (%p213_p2) target bundleno = 913 (0x391), region = 44  ;;  %v264_v2 = vunpack.c.l.s4 (!%p213_p2), %v1326_v1  ;;  %s1328_s28 = smov (!%p213_p2), 127   ;;  %1242 = vmatprep.subr.bf16.mxu1 (!%p213_p2), %v1331_v24  ;;  %v1336_v42 = vmov (!%p213_p2), 0   ;;  %v528_v43 = vld [vmem:[%s1583_s2] sm:$0xff] (!%p213_p2)  ;;  %vm1337_vm1 = vmmov (!%p213_p2), 0   ;;  %vm305_vm2 = vcmask (!%p213_p2), 257026  }
   0x7   : > { %v1384_v3 = vshrl.u32 (!%p213_p2), %v266_v0, 7  ;;  %s1329_s29 = smov (!%p213_p2), 110   ;;  %s1330_s30 = smov (!%p213_p2), 109   ;;  %620 = vmatprep.mubr.bf16.mxu0 (!%p213_p2), %v1336_v42  ;;  %1290 = vset.pattern.permute.xlu0 (!%p213_p2), %v1336_v42  ;;  %vm298_vm3 = vcmask (!%p213_p2), 1043456   ;;  %vm331_vm4 = vcmask (!%p213_p2), 1031168   ;;  %vm300_vm5 = vcmask (!%p213_p2), 1039360  }
   0x8   : > { %v265_v4 = vunpack.c.0.s8 (!%p213_p2), %v264_v2  ;;  %s1332_s7 = smov (!%p213_p2), 108   ;;  %s1333_s8 = smov (!%p213_p2), 92   ;;  %1291 = vset.pattern.permute.xlu1 (!%p213_p2), %v1336_v42  ;;  %1248 = vmatprep.mubr.msk.bf16.mxu1 (!%p213_p2), %vm1337_vm1, %v1331_v24  ;;  %vm391_vm6 = vcmask (!%p213_p2), 891904   ;;  %vm361_vm7 = vcmask (!%p213_p2), 900096   ;;  %vm421_vm8 = vcmask (!%p213_p2), 883712  }
   0x9   : > { %s1334_s9 = smov (!%p213_p2), 91   ;;  %s1335_s10 = smov (!%p213_p2), 90   ;;  %vm451_vm9 = vcmask (!%p213_p2), 752640   ;;  %vm481_vm10 = vcmask (!%p213_p2), 744448   ;;  %vm511_vm11 = vcmask (!%p213_p2), 736256   ;;  %vm578_vm12 = vcmask (!%p213_p2), 1041408  }
   0xa   : > { %v1388_v5 = vsub.s32 (!%p213_p2), %v265_v4, %v1384_v3  ;;  %vm574_vm13 = vcmask (!%p213_p2), 293888   ;;  %vm692_vm14 = vcmask (!%p213_p2), 150528   ;;  %vm694_vm15 = vcmask (!%p213_p2), 699800   ;;  %s1338_s17 = smov (!%p213_p2), 19  }
   0xb   : > { %693 = vst.msk [vmem:[#allocation3] sm:$0xf] (!%p213_p2), %vm692_vm14, %v1336_v42  ;;  %vm718_vm1 = vcmask (!%p213_p2), 1047556   ;;  %vm726_vm14 = vcmask (!%p213_p2), 257024  }
   0xc   : > { %695 = vst.msk [vmem:[#allocation3 + $0x8] sm:$0xf] (!%p213_p2), %vm694_vm15, %v1336_v42  ;;  %vm984_vm15 = vcmask (!%p213_p2), 588800  }
   0xd   : > { %s1589_s22 = smov (!%p242_p3, %s1183_s22), 1 }
   0xe   : > { %s1267_s23 = smul.u32 6, %s1589_s22 }
  0x10   : > { %s1393_s26 = scalar_lea.vmem %s1581_s0, %s1267_s23 }
  0x11   : > { %v307_v6 = vld [vmem:[%s1393_s26] sm:$0x3f] }
  0x12   : > { %v275_v7 = vld [vmem:[%s1393_s26] sm:$0x3f]  ;;  %v316_v9 = vrot.slane %v307_v6, %v1388_v5  ;;  %v309_v12 = vcombine.high %v307_v6, %v307_v6 }
  0x13   : > { %v337_v8 = vld [vmem:[%s1393_s26] sm:$0x3f]  ;;  %v291_v10 = vrot.slane %v275_v7, %v1388_v5  ;;  %v277_v14 = vcombine.low %v275_v7, %v275_v7 }
  0x14   : > { %v367_v11 = vld [vmem:[%s1393_s26] sm:$0x3f]  ;;  %324 = vrot.lane.b32.xlu1 %v316_v9, %s1327_s27  ;;  %v353_v15 = vrot.slane %v337_v8, %v1388_v5  ;;  %v323_v19 = vrot.slane %v309_v12, %v1388_v5  ;;  %v339_v21 = vcombine.low %v337_v8, %v337_v8 }
  0x15   : > { %v253_v13 = vld [vmem:[%s1393_s26] sm:$0x3f]  ;;  %294 = vrot.lane.b32.xlu0 %v291_v10, %s1328_s28  ;;  %v376_v16 = vrot.slane %v367_v11, %v1388_v5  ;;  %v369_v17 = vcombine.high %v367_v11, %v367_v11  ;;  %v284_v20 = vrot.slane %v277_v14, %v1388_v5 }
  0x16   : > { %1190 = vst.sshfl [vmem:[#allocation2] sm:$0xf pattern:$0x76325410] %v253_v13  ;;  %v255_v18 = vcombine.high %v253_v13, %v253_v13  ;;  %v397_v22 = vld [vmem:[%s1393_s26] sm:$0x3f]  ;;  %v346_v26 = vrot.slane %v339_v21, %v1388_v5 }
  0x17   : > { %v383_v25 = vrot.slane %v369_v17, %v1388_v5  ;;  %v399_v27 = vcombine.low %v397_v22, %v397_v22  ;;  %v427_v28 = vld [vmem:[%s1393_s26] sm:$0x3f]  ;;  %v413_v29 = vrot.slane %v397_v22, %v1388_v5 }
  0x18   : > { %356 = vrot.lane.b32.xlu1 %v353_v15, %s1329_s29  ;;  %v269_v23 = vrot.slane %v255_v18, %v1388_v5  ;;  %v429_v31 = vcombine.high %v427_v28, %v427_v28  ;;  %v457_v32 = vld [vmem:[%s1393_s26] sm:$0x3f]  ;;  %v436_v34 = vrot.slane %v427_v28, %v1388_v5 }
  0x19   : > { %384 = vrot.lane.b32.xlu0 %v376_v16, %s1330_s30  ;;  %v406_v30 = vrot.slane %v399_v27, %v1388_v5  ;;  %v459_v35 = vcombine.low %v457_v32, %v457_v32  ;;  %v487_v36 = vld [vmem:[%s1393_s26] sm:$0x3f]  ;;  %v473_v37 = vrot.slane %v457_v32, %v1388_v5 }
  0x1a   : > { %274 = vst.msk [vmem:[#allocation2 + $0x8] sm:$0x3] %vm273_vm0, %v269_v23  ;;  %v443_v33 = vrot.slane %v429_v31, %v1388_v5  ;;  %v489_v39 = vcombine.high %v487_v36, %v487_v36  ;;  %v496_v41 = vrot.slane %v487_v36, %v1388_v5 }
  0x1b   : > { %v466_v38 = vrot.slane %v459_v35, %v1388_v5 }
  0x1c   : > { %326 = vrot.lane.b32.xlu1 %v323_v19, %s1327_s27  ;;  %v503_v40 = vrot.slane %v489_v39, %v1388_v5 }
  0x1d   : > { %292 = vrot.lane.b32.xlu0 %v284_v20, %s1328_s28 }
  0x20   : > { %386 = vrot.lane.b32.xlu1 %v383_v25, %s1330_s30 }
  0x21   : > { %354 = vrot.lane.b32.xlu0 %v346_v26, %s1329_s29 }
  0x24   : > { %416 = vrot.lane.b32.xlu1 %v413_v29, %s1332_s7 }
  0x25   : > { %414 = vrot.lane.b32.xlu0 %v406_v30, %s1332_s7 }
  0x28   : > { %446 = vrot.lane.b32.xlu1 %v443_v33, %s1333_s8 }
  0x29   : > { %444 = vrot.lane.b32.xlu0 %v436_v34, %s1333_s8 }
  0x2c   : > { %476 = vrot.lane.b32.xlu1 %v473_v37, %s1334_s9 }
  0x2d   : > { %474 = vrot.lane.b32.xlu0 %v466_v38, %s1334_s9 }
  0x30   : > { %506 = vrot.lane.b32.xlu1 %v503_v40, %s1335_s10 }
  0x31   : > { %504 = vrot.lane.b32.xlu0 %v496_v41, %s1335_s10  ;;  %v517_v41 = vld [vmem:[%s1582_s1] sm:$0xf] }
  0x35   : > { %531 = vperm.xlu0 %1290, %v528_v43  }
  0x86   : > { %v325_v44 = vpop.permute.xlu1 %324 }
  0x87   : > { %v295_v45 = vpop.permute.xlu0 %294  ;;  %v328_v50 = vrot.slane %v325_v44, 4 }
  0x88   : > { %306 = vst.msk [vmem:[#allocation2 + $0x8] sm:$0xc] %vm305_vm2, %v295_v45  ;;  %v297_v51 = vrot.slane %v295_v45, 4 }
  0x8a   : > { %v357_v46 = vpop.permute.xlu1 %356 }
  0x8b   : > { %v385_v47 = vpop.permute.xlu0 %384  ;;  %366 = vst.msk [vmem:[#allocation2 + $0x14] sm:$0xc] %vm305_vm2, %v357_v46  ;;  %v359_v60 = vrot.slane %v357_v46, 4 }
  0x8c   : > { %v388_v61 = vrot.slane %v385_v47, 4 }
  0x8e   : > { %v327_v48 = vpop.permute.xlu1 %326 }
  0x8f   : > { %v293_v49 = vpop.permute.xlu0 %292  ;;  %v329_v52 = vrot.slane %v327_v48, 4  ;;  %336 = vst.msk [vmem:[#allocation2 + $0x14] sm:$0x3] %vm273_vm0, %v327_v48 }
  0x90   : > { %v296_v53 = vrot.slane %v293_v49, 4 }
  0x91   : > { %v330_v54 = vsel %vm298_vm3, %v328_v50, %v329_v52  ;;  %v680_v50 = vsub.s32 1, %v1384_v3 }
  0x92   : > { %v299_v55 = vsel %vm298_vm3, %v296_v53, %v297_v51  ;;  %v332_v56 = vsel %vm331_vm4, %v325_v44, %v330_v54  ;;  %v387_v58 = vpop.permute.xlu1 %386 }
  0x93   : > { %v301_v57 = vsel %vm300_vm5, %v293_v49, %v299_v55  ;;  %v355_v59 = vpop.permute.xlu0 %354  ;;  %335 = vst [vmem:[#allocation2 + $0xc] sm:$0x33] %v332_v56  ;;  %v389_v62 = vrot.slane %v387_v58, 4  ;;  %396 = vst.msk [vmem:[#allocation2 + $0x20] sm:$0x3] %vm273_vm0, %v387_v58  ;;  %v684_v55 = vsub.s32 2, %v1384_v3 }
  0x94   : > { %304 = vst [vmem:[#allocation2] sm:$0xcc] %v301_v57  ;;  %v358_v63 = vrot.slane %v355_v59, 4  ;;  %v672_v49 = vld [vmem:[%s1586_s5] sm:$0x7] }
  0x95   : > { %v390_v0 = vsel %vm298_vm3, %v388_v61, %v389_v62 }
  0x96   : > { %v360_v1 = vsel %vm298_vm3, %v358_v63, %v359_v60  ;;  %v392_v2 = vsel %vm391_vm6, %v385_v47, %v390_v0  ;;  %v417_v5 = vpop.permute.xlu1 %416  ;;  %v1301_v7 = vld [vmem:[#allocation2 + $0x8] ss:$12 sps:$4 sm:$0xff]   ;;  %v676_v47 = vsub.s32 0, %v1384_v3  ;;  %v681_v60 = vrot.slane %v672_v49, %v680_v50 }
  0x97   : > { %v362_v4 = vsel %vm361_vm7, %v355_v59, %v360_v1  ;;  %v415_v6 = vpop.permute.xlu0 %414  ;;  %395 = vst [vmem:[#allocation2 + $0x18] sm:$0x33] %v392_v2  ;;  %v419_v8 = vrot.slane %v417_v5, 4  ;;  %426 = vst.msk [vmem:[#allocation2 + $0x20] sm:$0xc] %vm305_vm2, %v417_v5  ;;  %1243 = vmatpush3.bf16.msra.mxu1 %v1301_v7  ;;  %v685_v2 = vrot.slane %v672_v49, %v684_v55 }
  0x98   : > { %365 = vst [vmem:[#allocation2 + $0xc] sm:$0xcc] %v362_v4  ;;  %v418_v9 = vrot.slane %v415_v6, 4  ;;  %1244 = vmatprep.subr.bf16.mxu1 %v1331_v24  ;;  %v677_v57 = vrot.slane %v672_v49, %v676_v47 }
  0x9a   : > { %v420_v10 = vsel %vm298_vm3, %v418_v9, %v419_v8  ;;  %v447_v12 = vpop.permute.xlu1 %446 }
  0x9b   : > { %v422_v11 = vsel %vm421_vm8, %v415_v6, %v420_v10  ;;  %v445_v13 = vpop.permute.xlu0 %444  ;;  %v449_v14 = vrot.slane %v447_v12, 4  ;;  %456 = vst.msk [vmem:[#allocation2 + $0x2c] sm:$0x3] %vm273_vm0, %v447_v12  ;;  %v518_v17 = vld [vmem:[#allocation2] sm:$0xff] }
  0x9c   : > { %425 = vst [vmem:[#allocation2 + $0x18] sm:$0xcc] %v422_v11  ;;  %v448_v15 = vrot.slane %v445_v13, 4 }
  0x9e   : > { %v450_v16 = vsel %vm298_vm3, %v448_v15, %v449_v14  ;;  %v477_v19 = vpop.permute.xlu1 %476 }
  0x9f   : > { %v452_v18 = vsel %vm451_vm9, %v445_v13, %v450_v16  ;;  %v475_v20 = vpop.permute.xlu0 %474  ;;  %v520_v21 = vld [vmem:[#allocation2 + $0xc] sm:$0xff]  ;;  %v479_v23 = vrot.slane %v477_v19, 4  ;;  %486 = vst.msk [vmem:[#allocation2 + $0x2c] sm:$0xc] %vm305_vm2, %v477_v19  ;;  %vm712_vm2 = vcmask 154624  }
  0xa0   : > { %v1302_v22 = vld [vmem:[#allocation2 + $0x4] ss:$12 sps:$4 sm:$0xff]   ;;  %455 = vst [vmem:[#allocation2 + $0x24] sm:$0x33] %v452_v18  ;;  %v478_v25 = vrot.slane %v475_v20, 4  ;;  %v1191_v26 = vcombine.low %v518_v17, %v520_v21 }
  0xa1   : > { %588 = vmatprep.subr.bf16.mxu0 %v1302_v22  ;;  %v1502_v22 = vld [vmem:[%s1584_s3] sm:$0xff]  }
  0xa2   : > { %v480_v27 = vsel %vm298_vm3, %v478_v25, %v479_v23  ;;  %589 = vmatpush1.bf16.msra.mxu0 %v1191_v26  ;;  %v507_v29 = vpop.permute.xlu1 %506  ;;  %v878_v25 = vld [vmem:[%s1585_s4] sm:$0xff]  ;;  %v880_v26 = vld [vmem:[%s1585_s4 + $0x10] sm:$0xff] }
  0xa3   : > { %v482_v28 = vsel %vm481_vm10, %v475_v20, %v480_v27  ;;  %v505_v30 = vpop.permute.xlu0 %504  ;;  %v509_v31 = vrot.slane %v507_v29, 4  ;;  %516 = vst.msk [vmem:[#allocation2 + $0x38] sm:$0x3] %vm273_vm0, %v507_v29  ;;  %vm717_vm0 = vcmask 1043608   ;;  %v879_v27 = vld [vmem:[%s1585_s4 + $0x8] sm:$0xff] }
  0xa4   : > { %485 = vst [vmem:[#allocation2 + $0x24] sm:$0xcc] %v482_v28  ;;  %v508_v32 = vrot.slane %v505_v30, 4  ;;  %v881_v28 = vld [vmem:[%s1585_s4 + $0x18] sm:$0xff] }
  0xa6   : > { %v510_v33 = vsel %vm298_vm3, %v508_v32, %v509_v31  ;;  %v1304_v35 = vld [vmem:[#allocation2 + $0x20] ss:$12 sps:$4 sm:$0xff]  }
  0xa7   : > { %v512_v34 = vsel %vm511_vm11, %v505_v30, %v510_v33  ;;  %1245 = vmatpush3.bf16.msra.mxu1 %v1304_v35 }
  0xa8   : > { %515 = vst [vmem:[#allocation2 + $0x30] sm:$0x33] %v512_v34  ;;  %1246 = vmatprep.subr.bf16.mxu1 %v1331_v24 }
  0xaa   : > { %v1308_v38 = vld [vmem:[#allocation2 + $0x38] ss:$0 sps:$4 sm:$0x33]  }
  0xab   : > { %v1305_v36 = vld [vmem:[#allocation2 + $0x1c] ss:$12 sps:$4 sm:$0xff]   ;;  %v1307_v37 = vld [vmem:[#allocation2 + $0x18] ss:$12 sps:$4 sm:$0xff]   ;;  %v586_v39 = vsel %vm578_vm12, %v1308_v38, 0 }
  0xac   : > { %590 = vmatprep.subr.bf16.mxu0 %v1305_v36  ;;  %1247 = vmatpush3.bf16.msra.mxu1 %v586_v39 }
  0xad   : > { %591 = vmatpush1.bf16.msra.mxu0 %v1307_v37 }
  0xaf   : > { %v526_v40 = vld [vmem:[#allocation2 + $0x30] sm:$0x33]  ;;  %1249 = vmatmul.mubr.msk.bf16.vlgmr.msra.gmra.mrb[0].mxu1 %vm574_vm13, %v517_v41 }
  0xb0   : > { %v1198_v43 = vcombine.high %v526_v40, %v526_v40  ;;  %v1197_v44 = vcombine.low %v526_v40, %v526_v40  ;;  %1262 = vmatprep.mubr.msk.bf16.mxu1 %vm984_vm15, %v1502_v22 }
  0xb2   : > { %1200 = vmatprep.subr.msk.bf16.mxu0 %vm578_vm12, %v1198_v43  ;;  %v580_v45 = vsel %vm578_vm12, %v1197_v44, 0  ;;  %vm719_vm12 = vmor %vm718_vm1, %vm717_vm0 }
  0xb3   : > { %593 = vmatpush1.bf16.msra.mxu0 %v580_v45 }
  0xb4   : > { %v532_v46 = vpop.permute.xlu0 %531 }
  0xb6   : > { %1201 = vmatmul.mubr.msk.bf16.vlgmr.msra.gmra.mrb[0].mxu0 %vm574_vm13, %v517_v41  ;;  %vm721_vm13 = vcmask 412672  }
  0xb7   : > { %1033 = vmatprep.mubr.bf16.mxu0 %v1336_v42 }
 0x182   : > { %v663_v24 = vpop.f32.mrb[0].mxu1 }
 0x183   : > { %v1250_v48 = vpop.f32.mrb[1].mxu1  ;;  %v664_v54 = vadd.f32 %v663_v24, %v532_v46 }
 0x184   : > { %v666_v51 = vpop.f32.mrb[2].mxu1 }
 0x185   : > { %v1251_v52 = vpop.f32.mrb[3].mxu1  ;;  %v671_v1 = vmax.f32 %v664_v54, 0.0 }
 0x187   : > { %v691_v6 = vmul.f32 %v685_v2, %v671_v1 }
 0x189   : > { %v622_v53 = vpop.f32.mrb[0].mxu0  ;;  %v1230_v3 = vpack.c.bf16 %v691_v6, %v691_v6 }
 0x18a   : > { %v623_v56 = vadd.f32 %v622_v53, %v532_v46  ;;  %v624_v58 = vpop.f32.mrb[1].mxu0 }
 0x18b   : > { %v625_v59 = vadd.f32 %v624_v58, %v532_v46  ;;  %v626_v61 = vpop.f32.mrb[2].mxu0 }
 0x18c   : > { %v669_v62 = vmax.f32 %v623_v56, 0.0  ;;  %v627_v63 = vpop.f32.mrb[3].mxu0 }
 0x18d   : > { %v670_v0 = vmax.f32 %v625_v59, 0.0 }
 0x18e   : > { %v689_v4 = vmul.f32 %v677_v57, %v669_v62 }
 0x18f   : > { %v690_v5 = vmul.f32 %v681_v60, %v670_v0 }
 0x191   : > { %v1229_v7 = vpack.c.bf16 %v690_v5, %v689_v4 }
 0x193   : > { %707 = vrot.lane.b32.xlu1 %v1229_v7, %s1338_s17 }
 0x197   : > { %709 = vrot.lane.b32.xlu1 %v1230_v3, %s1338_s17 }
 0x205   : > { %v708_v8 = vpop.permute.xlu1 %707 }
 0x206   : > { %v711_v9 = vrot.slane %v708_v8, 4 }
 0x208   : > { %v713_v10 = vsel %vm712_vm2, %v711_v9, %v708_v8 }
 0x209   : > { %720 = vst.msk [vmem:[#allocation3] sm:$0xff] %vm719_vm12, %v713_v10  ;;  %v710_v11 = vpop.permute.xlu1 %709 }
 0x20a   : > { %v714_v12 = vsel %vm712_vm2, %v711_v9, %v710_v11 }
 0x20b   : > { %722 = vst.msk [vmem:[#allocation3 + $0x8] sm:$0xf] %vm721_vm13, %v714_v12 }
 0x210   : > { %v723_v13 = vld [vmem:[#allocation3] sm:$0xff] }
 0x211   : > { %732 = vrot.lane.b32.xlu0 %v723_v13, %s1328_s28 }
 0x212   : > { %v724_v14 = vld [vmem:[#allocation3 + $0x8] sm:$0xf] }
 0x213   : > { %v729_v15 = vld [vmem:[#allocation3 + $0x8] sm:$0xf]  ;;  %727 = vst.msk [vmem:[#allocation4 + $0x8] sm:$0xf] %vm726_vm14, %v724_v14 }
 0x214   : > { %734 = vrot.lane.b32.xlu1 %v729_v15, %s1328_s28  ;;  %v745_v16 = vld [vmem:[#allocation3 + $0x8] sm:$0xf] }
 0x215   : > { %748 = vrot.lane.b32.xlu0 %v723_v13, %s1327_s27  ;;  %v761_v17 = vld [vmem:[#allocation3 + $0x8] sm:$0xf] }
 0x216   : > { %v777_v18 = vld [vmem:[#allocation3 + $0x8] sm:$0xf] }
 0x217   : > { %v793_v19 = vld [vmem:[#allocation3 + $0x8] sm:$0xf] }
 0x218   : > { %750 = vrot.lane.b32.xlu1 %v745_v16, %s1327_s27  ;;  %v809_v20 = vld [vmem:[#allocation3 + $0x8] sm:$0xf] }
 0x219   : > { %764 = vrot.lane.b32.xlu0 %v723_v13, %s1329_s29  ;;  %v825_v21 = vld [vmem:[#allocation3 + $0x8] sm:$0xf] }
 0x21a   : > { %v841_v23 = vld [vmem:[#allocation3 + $0x8] sm:$0xf] }
 0x21c   : > { %766 = vrot.lane.b32.xlu1 %v761_v17, %s1329_s29 }
 0x21d   : > { %780 = vrot.lane.b32.xlu0 %v723_v13, %s1330_s30 }
 0x220   : > { %782 = vrot.lane.b32.xlu1 %v777_v18, %s1330_s30 }
 0x221   : > { %796 = vrot.lane.b32.xlu0 %v723_v13, %s1332_s7 }
 0x224   : > { %798 = vrot.lane.b32.xlu1 %v793_v19, %s1332_s7 }
 0x225   : > { %812 = vrot.lane.b32.xlu0 %v723_v13, %s1333_s8 }
 0x228   : > { %814 = vrot.lane.b32.xlu1 %v809_v20, %s1333_s8  ;;  %s1268_s8 = smul.u32 96, %s1589_s22 }
 0x229   : > { %828 = vrot.lane.b32.xlu0 %v723_v13, %s1334_s9 }
 0x22a   : > { %s1560_s11 = scalar_lea.vmem %s1587_s6, %s1268_s8 }
 0x22c   : > { %830 = vrot.lane.b32.xlu1 %v825_v21, %s1334_s9 }
 0x22d   : > { %844 = vrot.lane.b32.xlu0 %v723_v13, %s1335_s10 }
 0x230   : > { %846 = vrot.lane.b32.xlu1 %v841_v23, %s1335_s10 }
 0x231   : > { %884 = vperm.xlu0 %1290, %v878_v25  }
 0x234   : > { %889 = vperm.xlu1 %1291, %v879_v27  }
 0x235   : > { %894 = vperm.xlu0 %1290, %v880_v26  }
 0x238   : > { %899 = vperm.xlu1 %1291, %v881_v28  }
 0x283   : > { %v733_v29 = vpop.permute.xlu0 %732 }
 0x284   : > { %v736_v31 = vrot.slane %v733_v29, 4 }
 0x286   : > { %v735_v30 = vpop.permute.xlu1 %734 }
 0x287   : > { %v737_v32 = vrot.slane %v735_v30, 4  ;;  %743 = vst.msk [vmem:[#allocation4 + $0x14] sm:$0xf] %vm726_vm14, %v735_v30  ;;  %v749_v33 = vpop.permute.xlu0 %748 }
 0x288   : > { %v752_v37 = vrot.slane %v749_v33, 4 }
 0x289   : > { %v738_v34 = vsel %vm298_vm3, %v736_v31, %v737_v32  ;;  %v1317_v32 = vld [vmem:[%s1584_s3 + $0x8] sm:$0xff]  }
 0x28a   : > { %v739_v35 = vsel %vm300_vm5, %v733_v29, %v738_v34  ;;  %v751_v36 = vpop.permute.xlu1 %750 }
 0x28b   : > { %v753_v38 = vrot.slane %v751_v36, 4  ;;  %759 = vst.msk [vmem:[#allocation4 + $0x20] sm:$0xf] %vm726_vm14, %v751_v36  ;;  %v1207_v39 = vcombine.low %v723_v13, %v739_v35  ;;  %v1208_v40 = vcombine.high %v723_v13, %v739_v35  ;;  %v765_v41 = vpop.permute.xlu0 %764 }
 0x28c   : > { %v768_v46 = vrot.slane %v765_v41, 4 }
 0x28d   : > { %v754_v43 = vsel %vm298_vm3, %v752_v37, %v753_v38  ;;  %1001 = vmatprep.subr.bf16.mxu0 %v1208_v40 }
 0x28e   : > { %v755_v44 = vsel %vm331_vm4, %v749_v33, %v754_v43  ;;  %v767_v45 = vpop.permute.xlu1 %766  ;;  %v1311_v24 = vld [vmem:[#allocation4 + $0x8] ss:$12 sps:$4 sm:$0xff]   ;;  %1002 = vmatpush1.bf16.msra.mxu0 %v1207_v39 }
 0x28f   : > { %v769_v47 = vrot.slane %v767_v45, 4  ;;  %775 = vst.msk [vmem:[#allocation4 + $0x2c] sm:$0xf] %vm726_vm14, %v767_v45  ;;  %v781_v48 = vpop.permute.xlu0 %780  ;;  %1252 = vmatprep.subr.bf16.mxu1 %v1311_v24 }
 0x290   : > { %1253 = vmatpush3.bf16.msra.mxu1 %v1311_v24  ;;  %v784_v52 = vrot.slane %v781_v48, 4 }
 0x291   : > { %v770_v49 = vsel %vm298_vm3, %v768_v46, %v769_v47 }
 0x292   : > { %v771_v50 = vsel %vm361_vm7, %v765_v41, %v770_v49  ;;  %v783_v51 = vpop.permute.xlu1 %782 }
 0x293   : > { %v785_v53 = vrot.slane %v783_v51, 4  ;;  %791 = vst.msk [vmem:[#allocation4 + $0x38] sm:$0xf] %vm726_vm14, %v783_v51  ;;  %v1210_v54 = vcombine.low %v755_v44, %v771_v50  ;;  %v1211_v55 = vcombine.high %v755_v44, %v771_v50  ;;  %v797_v56 = vpop.permute.xlu0 %796 }
 0x294   : > { %v800_v61 = vrot.slane %v797_v56, 4 }
 0x295   : > { %v786_v57 = vsel %vm298_vm3, %v784_v52, %v785_v53  ;;  %1003 = vmatprep.subr.bf16.mxu0 %v1211_v55 }
 0x296   : > { %v787_v58 = vsel %vm391_vm6, %v781_v48, %v786_v57  ;;  %v799_v59 = vpop.permute.xlu1 %798  ;;  %v1312_v60 = vld [vmem:[#allocation4 + $0x20] ss:$12 sps:$4 sm:$0xff]   ;;  %1004 = vmatpush1.bf16.msra.mxu0 %v1210_v54 }
 0x297   : > { %v801_v62 = vrot.slane %v799_v59, 4  ;;  %807 = vst.msk [vmem:[#allocation4 + $0x44] sm:$0xf] %vm726_vm14, %v799_v59  ;;  %v813_v63 = vpop.permute.xlu0 %812  ;;  %1254 = vmatprep.subr.bf16.mxu1 %v1312_v60 }
 0x298   : > { %1255 = vmatpush3.bf16.msra.mxu1 %v1312_v60  ;;  %v816_v4 = vrot.slane %v813_v63, 4 }
 0x299   : > { %v802_v0 = vsel %vm298_vm3, %v800_v61, %v801_v62 }
 0x29a   : > { %v803_v1 = vsel %vm421_vm8, %v797_v56, %v802_v0  ;;  %v815_v2 = vpop.permute.xlu1 %814 }
 0x29b   : > { %v817_v5 = vrot.slane %v815_v2, 4  ;;  %823 = vst.msk [vmem:[#allocation4 + $0x50] sm:$0xf] %vm726_vm14, %v815_v2  ;;  %v1213_v6 = vcombine.low %v787_v58, %v803_v1  ;;  %v1214_v7 = vcombine.high %v787_v58, %v803_v1  ;;  %v829_v3 = vpop.permute.xlu0 %828 }
 0x29c   : > { %v832_v12 = vrot.slane %v829_v3, 4 }
 0x29d   : > { %v818_v8 = vsel %vm298_vm3, %v816_v4, %v817_v5  ;;  %1005 = vmatprep.subr.bf16.mxu0 %v1214_v7 }
 0x29e   : > { %v819_v9 = vsel %vm451_vm9, %v813_v63, %v818_v8  ;;  %v831_v10 = vpop.permute.xlu1 %830  ;;  %v1313_v11 = vld [vmem:[#allocation4 + $0x38] ss:$12 sps:$4 sm:$0xff]   ;;  %1006 = vmatpush1.bf16.msra.mxu0 %v1213_v6 }
 0x29f   : > { %v833_v13 = vrot.slane %v831_v10, 4  ;;  %839 = vst.msk [vmem:[#allocation4 + $0x5c] sm:$0xf] %vm726_vm14, %v831_v10  ;;  %v845_v14 = vpop.permute.xlu0 %844  ;;  %1256 = vmatprep.subr.bf16.mxu1 %v1313_v11 }
 0x2a0   : > { %1257 = vmatpush3.bf16.msra.mxu1 %v1313_v11  ;;  %v848_v18 = vrot.slane %v845_v14, 4 }
 0x2a1   : > { %v834_v15 = vsel %vm298_vm3, %v832_v12, %v833_v13 }
 0x2a2   : > { %v835_v16 = vsel %vm481_vm10, %v829_v3, %v834_v15  ;;  %v847_v17 = vpop.permute.xlu1 %846 }
 0x2a3   : > { %v849_v19 = vrot.slane %v847_v17, 4  ;;  %855 = vst.msk [vmem:[#allocation4 + $0x68] sm:$0xf] %vm726_vm14, %v847_v17  ;;  %v1216_v20 = vcombine.low %v819_v9, %v835_v16  ;;  %v1217_v21 = vcombine.high %v819_v9, %v835_v16 }
 0x2a5   : > { %v850_v23 = vsel %vm298_vm3, %v848_v18, %v849_v19  ;;  %1007 = vmatprep.subr.bf16.mxu0 %v1217_v21 }
 0x2a6   : > { %v851_v25 = vsel %vm511_vm11, %v845_v14, %v850_v23  ;;  %v1314_v26 = vld [vmem:[#allocation4 + $0x50] ss:$12 sps:$4 sm:$0xff]   ;;  %1008 = vmatpush1.bf16.msra.mxu0 %v1216_v20 }
 0x2a7   : > { %v1220_v27 = vcombine.high %v851_v25, %v851_v25  ;;  %v1219_v28 = vcombine.low %v851_v25, %v851_v25  ;;  %1258 = vmatprep.subr.bf16.mxu1 %v1314_v26 }
 0x2a8   : > { %1259 = vmatpush3.bf16.msra.mxu1 %v1314_v26 }
 0x2a9   : > { %1222 = vmatprep.subr.msk.bf16.mxu0 %vm298_vm3, %v1220_v27  ;;  %v993_v29 = vsel %vm298_vm3, %v1219_v28, 0 }
 0x2aa   : > { %v1315_v30 = vld [vmem:[#allocation4 + $0x68] ss:$0 sps:$4 sm:$0xff]   ;;  %1010 = vmatpush1.bf16.msra.mxu0 %v993_v29 }
 0x2ab   : > { %1266 = vmatprep.subr.msk.bf16.mxu1 %vm298_vm3, %v1315_v30  ;;  %v999_v31 = vsel %vm298_vm3, %v1315_v30, 0  ;;  %vm1117_vm3 = vcmask 261120  }
 0x2ac   : > { %1261 = vmatpush3.bf16.msra.mxu1 %v999_v31 }
 0x2ad   : > { %1223 = vmatmul.mubr.msk.bf16.vlgmr.msra.gmra.mrb[4].mxu0 %vm984_vm15, %v1502_v22 }
 0x2ae   : > { %1043 = vmatprep.mubr.bf16.mxu0 %v1336_v42 }
 0x2af   : > { %1263 = vmatmul.mubr.msk.bf16.vlgmr.msra.gmra.mrb[4].mxu1 %vm984_vm15, %v1317_v32 }
 0x2b0   : > { %v885_v33 = vpop.permute.xlu0 %884 }
 0x2b3   : > { %v890_v34 = vpop.permute.xlu1 %889 }
 0x2b4   : > { %v895_v36 = vpop.permute.xlu0 %894 }
 0x2b5   : > { %1224 = vmatmul.mubr.msk.bf16.gmra.mrb[8].mxu0 %vm984_vm15, %v1317_v32 }
 0x2b7   : > { %v900_v42 = vpop.permute.xlu1 %899 }
 0x380   : > { %v1035_v35 = vpop.f32.mrb[4].mxu0 }
 0x381   : > { %v1036_v37 = vadd.f32 %v1035_v35, %v885_v33  ;;  %v1037_v38 = vpop.f32.mrb[5].mxu0 }
 0x382   : > { %v1038_v22 = vadd.f32 %v1037_v38, %v885_v33  ;;  %v1039_v39 = vpop.f32.mrb[6].mxu0  ;;  %v1264_v40 = vpop.f32.mrb[4].mxu1 }
 0x383   : > { %v1103_v41 = vmax.f32 %v1036_v37, 0.0  ;;  %v1040_v43 = vadd.f32 %v1039_v39, %v890_v34  ;;  %v1041_v44 = vpop.f32.mrb[7].mxu0  ;;  %v1097_v45 = vadd.f32 %v1264_v40, %v895_v36  ;;  %v1088_v24 = vpop.f32.mrb[5].mxu1 }
 0x384   : > { %v1104_v46 = vmax.f32 %v1038_v22, 0.0  ;;  %v1042_v47 = vadd.f32 %v1041_v44, %v890_v34  ;;  %v1089_v48 = vadd.f32 %v1088_v24, %v885_v33  ;;  %v1265_v50 = vpop.f32.mrb[6].mxu1 }
 0x385   : > { %1115 = vst [vmem:[%s1560_s11] sm:$0xff] %v1103_v41  ;;  %v1106_v49 = vmax.f32 %v1040_v43, 0.0  ;;  %v1111_v51 = vmax.f32 %v1097_v45, 0.0  ;;  %v1100_v53 = vadd.f32 %v1265_v50, %v900_v42  ;;  %v1091_v54 = vpop.f32.mrb[7].mxu1 }
 0x386   : > { %1116 = vst [vmem:[%s1560_s11 + $0x8] sm:$0xff] %v1104_v46  ;;  %v1107_v52 = vmax.f32 %v1042_v47, 0.0  ;;  %v1105_v55 = vmax.f32 %v1089_v48, 0.0  ;;  %v1092_v56 = vadd.f32 %v1091_v54, %v890_v34 }
 0x387   : > { %1119 = vst [vmem:[%s1560_s11 + $0x18] sm:$0xff] %v1106_v49  ;;  %1124 = vst.msk [vmem:[%s1560_s11 + $0x40] sm:$0xff] %vm1117_vm3, %v1111_v51  ;;  %v1114_v57 = vmax.f32 %v1100_v53, 0.0 }
 0x388   : > { %1120 = vst [vmem:[%s1560_s11 + $0x20] sm:$0xff] %v1107_v52  ;;  %v1045_v58 = vpop.f32.mrb[8].mxu0  ;;  %1118 = vst.msk [vmem:[%s1560_s11 + $0x10] sm:$0xff] %vm1117_vm3, %v1105_v55  ;;  %v1108_v59 = vmax.f32 %v1092_v56, 0.0 }
 0x389   : > { %v1046_v60 = vadd.f32 %v1045_v58, %v895_v36  ;;  %v1047_v61 = vpop.f32.mrb[9].mxu0  ;;  %1127 = vst.msk [vmem:[%s1560_s11 + $0x58] sm:$0xff] %vm1117_vm3, %v1114_v57 }
 0x38a   : > { %v1048_v62 = vadd.f32 %v1047_v61, %v895_v36  ;;  %v1049_v63 = vpop.f32.mrb[10].mxu0  ;;  %1121 = vst.msk [vmem:[%s1560_s11 + $0x28] sm:$0xff] %vm1117_vm3, %v1108_v59 }
 0x38b   : > { %v1109_v0 = vmax.f32 %v1046_v60, 0.0  ;;  %v1050_v1 = vadd.f32 %v1049_v63, %v900_v42  ;;  %v1051_v2 = vpop.f32.mrb[11].mxu0 }
 0x38c   : > { %v1110_v4 = vmax.f32 %v1048_v62, 0.0  ;;  %v1052_v5 = vadd.f32 %v1051_v2, %v900_v42 }
 0x38d   : > { %1122 = vst [vmem:[%s1560_s11 + $0x30] sm:$0xff] %v1109_v0  ;;  %v1112_v6 = vmax.f32 %v1050_v1, 0.0 }
 0x38e   : > { %1123 = vst [vmem:[%s1560_s11 + $0x38] sm:$0xff] %v1110_v4  ;;  %v1113_v7 = vmax.f32 %v1052_v5, 0.0 }
 0x38f   : > { %1125 = vst [vmem:[%s1560_s11 + $0x48] sm:$0xff] %v1112_v6 }
 0x390   : > { %1126 = vst [vmem:[%s1560_s11 + $0x50] sm:$0xff] %v1113_v7 }
 0x391 PF: > { %s16_s21 = sadd.s32 1, %s1324_s21  }
 0x392   : > { %p13_p4 = scmp.ge.s32.totalorder %s16_s21, 4  }
 0x394   :  { %15 = sbr.rel (!%p13_p4) target bundleno = 1 (0x1), region = 74 }

</bundles_post_ra>
